<compile_context>
chip_gen: v6e
topology: v6e:2x2x1
jax: 0.10.0
libtpu: 0.0.40
codegen_flags: <defaults>
</compile_context>

<pallas_src>
import functools

import jax
import jax.numpy as jnp
from jax.experimental import pallas as pl
from jax.experimental.pallas import tpu as pltpu


def _target_kernel(*refs, conf, limit, tn, use_class):
    if use_class:
        post_ref, out_ref, acc_ref, ff_ref = refs
        box_ref = None
    else:
        post_ref, box_ref, out_ref, acc_ref, ff_ref = refs

    pid = pl.program_id(0)

    @pl.when(pid == 0)
    def _init():
        acc_ref[0] = jnp.float32(0.0)
        ff_ref[0] = jnp.int32(limit)

    # Skip compute for tiles that start at/after the already-found break row.
    @pl.when(ff_ref[0] > pid * tn)
    def _compute():
        post = post_ref[...].astype(jnp.float32)           # [C, TN]
        col_max = jnp.max(post, axis=0, keepdims=True)     # [1, TN] per-row max

        lane = jax.lax.broadcasted_iota(jnp.int32, (1, tn), 1)
        gidx = lane + pid * tn                             # global row index
        in_range = gidx < limit                            # mask lane padding

        # first (global) row whose max score < conf -> where the torch loop breaks
        fail = jnp.where((col_max < conf) & in_range, gidx, limit)
        first_fail = jnp.minimum(ff_ref[0], jnp.min(fail))
        ff_ref[0] = first_fail

        valid = in_range & (gidx < first_fail)             # rows actually summed

        if use_class:   # 'class' or 'all' (torch elif never reaches boxes for 'all')
            tile_sum = jnp.sum(jnp.where(valid, col_max, 0.0))
        else:           # 'box'
            boxes = box_ref[...].astype(jnp.float32)       # [4, TN]
            tile_sum = jnp.sum(jnp.where(valid, boxes, 0.0))

        acc_ref[0] = acc_ref[0] + tile_sum

    @pl.when(pid == pl.num_programs(0) - 1)
    def _emit():
        out_ref[0, 0] = acc_ref[0]


@functools.partial(
    jax.jit, static_argnames=("output_type", "conf", "ratio", "tile_n")
)
def yolov8_target_pallas(post_result, pre_post_boxes, *, output_type, conf,
                         ratio, tile_n=2048):
    """post_result: [N, C], pre_post_boxes: [N, 4] -> scalar f32.

    Matches yolov8_target(output_type, conf, ratio).forward((post, boxes)).
    """
    assert tile_n % 128 == 0
    n = post_result.shape[0]
    limit = int(n * ratio)                      # static, from module config
    if limit <= 0 or output_type not in ("class", "box", "all"):
        return jnp.float32(0.0)

    use_class = output_type in ("class", "all")

    # Only the first `limit` rows are ever inspected -> never DMA the rest.
    # Transpose so N maps to lanes (lane-dense): [C, limit] / [4, limit].
    post_t = jnp.transpose(post_result[:limit, :])
    c = post_t.shape[0]

    tn = limit if limit <= tile_n else tile_n    # tile_n is a multiple of 128
    grid = (pl.cdiv(limit, tn),)

    args = [post_t]
    in_specs = [pl.BlockSpec((c, tn), lambda i: (0, i))]
    if not use_class:
        box_t = jnp.transpose(pre_post_boxes[:limit, :])   # [4, limit]
        args.append(box_t)
        in_specs.append(pl.BlockSpec((4, tn), lambda i: (0, i)))

    kernel = functools.partial(
        _target_kernel, conf=float(conf), limit=limit, tn=tn, use_class=use_class
    )

    out = pl.pallas_call(
        kernel,
        out_shape=jax.ShapeDtypeStruct((1, 1), jnp.float32),
        grid=grid,
        in_specs=in_specs,
        out_specs=pl.BlockSpec(memory_space=pltpu.MemorySpace.SMEM),
        scratch_shapes=[
            pltpu.SMEM((1,), jnp.float32),   # running sum (carried)
            pltpu.SMEM((1,), jnp.int32),     # first failing row (carried)
        ],
        compiler_params=pltpu.CompilerParams(
            dimension_semantics=("arbitrary",),
        ),
    )(*args)
    return out[0, 0]


def _reference(post_result, pre_post_boxes, output_type, conf, ratio):
    # Mimics the PyTorch forward exactly (Python loop with early break).
    import numpy as np
    pr = np.asarray(post_result)
    bx = np.asarray(pre_post_boxes)
    result = []
    for i in range(int(pr.shape[0] * ratio)):
        if float(pr[i].max()) < conf:
            break
        if output_type == "class" or output_type == "all":
            result.append(float(pr[i].max()))
        elif output_type == "box" or output_type == "all":
            for j in range(4):
                result.append(float(bx[i, j]))
    return float(sum(result))


if __name__ == "__main__":
    key = jax.random.PRNGKey(0)
    k1, k2, k3, k4 = jax.random.split(key, 4)

    def check(post, boxes, output_type, conf, ratio, tile_n=2048):
        out = yolov8_target_pallas(
            post, boxes, output_type=output_type, conf=conf, ratio=ratio,
            tile_n=tile_n,
        )
        out = jax.block_until_ready(out)
        ref = _reference(post, boxes, output_type, conf, ratio)
        return abs(float(out) - ref) <= 1e-3 * max(1.0, abs(ref))

    ok = True

    # Small case: single grid step.
    N, C = 16, 8
    post_small = jax.random.uniform(k1, (N, C), dtype=jnp.float32)
    boxes_small = jax.random.uniform(k2, (N, 4), dtype=jnp.float32) * 16.0
    for output_type in ("class", "box", "all"):
        ok &= check(post_small, boxes_small, output_type, conf=0.25, ratio=0.5)
        ok &= check(post_small, boxes_small, output_type, conf=0.90, ratio=0.5)

    # Moderate case: lane-dense path, both single-step (default tile) and the
    # multi-step carried-state path (tile_n=256, incl. a padded last tile).
    N2, C2 = 1024, 16
    post_big = jax.random.uniform(k3, (N2, C2), dtype=jnp.float32)
    boxes_big = jax.random.uniform(k4, (N2, 4), dtype=jnp.float32) * 16.0
    for output_type in ("class", "box", "all"):
        ok &= check(post_big, boxes_big, output_type, conf=0.20, ratio=0.75)
        ok &= check(post_big, boxes_big, output_type, conf=0.97, ratio=0.75)
        ok &= check(post_big, boxes_big, output_type, conf=0.20, ratio=0.75,
                    tile_n=256)
        ok &= check(post_big, boxes_big, output_type, conf=0.97, ratio=0.75,
                    tile_n=256)

    assert ok
    print("KERNEL_OK")
</pallas_src>

<mosaic_0001>
module attributes {stable_mosaic.version = 11 : i64} {
  func.func @_target_kernel(%arg0: i32, %arg1: memref<8x8xf32, #tpu.memory_space<vmem>>, %arg2: memref<1x1xf32, #tpu.memory_space<smem>>, %arg3: memref<1xf32, #tpu.memory_space<smem>>, %arg4: memref<1xi32, #tpu.memory_space<smem>>) attributes {dimension_semantics = [#tpu.dimension_semantics<arbitrary>], iteration_bounds = array<i64: 1>, scalar_prefetch = 0 : i64, scratch_operands = 2 : i64, tpu.core_type = #tpu.core_type<tc>, window_params = [{transform_indices = @transform_0, window_bounds = array<i64: 8, 8>}, {transform_indices = @transform_1, window_bounds = array<i64: 1, 1>}]} {
    %c0_i32 = arith.constant 0 : i32
    %0 = arith.cmpi eq, %arg0, %c0_i32 : i32
    %1 = arith.extui %0 : i1 to i32
    %c0_i32_0 = arith.constant 0 : i32
    %2 = arith.cmpi ne, %1, %c0_i32_0 : i32
    scf.if %2 {
      %cst = arith.constant 0.000000e+00 : f32
      %c0_4 = arith.constant 0 : index
      %11 = memref.load %arg3[%c0_4] : memref<1xf32, #tpu.memory_space<smem>>
      memref.store %cst, %arg3[%c0_4] : memref<1xf32, #tpu.memory_space<smem>>
      %c8_i32_5 = arith.constant 8 : i32
      %c0_6 = arith.constant 0 : index
      %12 = memref.load %arg4[%c0_6] : memref<1xi32, #tpu.memory_space<smem>>
      memref.store %c8_i32_5, %arg4[%c0_6] : memref<1xi32, #tpu.memory_space<smem>>
    } else {
    }
    %c0 = arith.constant 0 : index
    %3 = memref.load %arg4[%c0] : memref<1xi32, #tpu.memory_space<smem>>
    %c8_i32 = arith.constant 8 : i32
    %4 = arith.muli %arg0, %c8_i32 : i32
    %5 = arith.cmpi sgt, %3, %4 : i32
    %6 = arith.extui %5 : i1 to i32
    %c0_i32_1 = arith.constant 0 : i32
    %7 = arith.cmpi ne, %6, %c0_i32_1 : i32
    scf.if %7 {
      %c0_4 = arith.constant 0 : index
      %c0_5 = arith.constant 0 : index
      %11 = vector.load %arg1[%c0_4, %c0_5] : memref<8x8xf32, #tpu.memory_space<vmem>>, vector<8x8xf32>
      %cst = arith.constant dense<0xFF800000> : vector<8xf32>
      %12 = vector.multi_reduction <maximumf>, %11, %cst [0] : vector<8x8xf32> to vector<8xf32>
      %13 = vector.shape_cast %12 : vector<8xf32> to vector<1x8xf32>
      %14 = tpu.iota {dimensions = array<i32: 1>} : vector<1x8xi32>
      %c8_i32_6 = arith.constant 8 : i32
      %15 = arith.muli %arg0, %c8_i32_6 : i32
      %16 = vector.broadcast %15 : i32 to vector<1x8xi32>
      %17 = arith.addi %14, %16 : vector<1x8xi32>
      %c8_i32_7 = arith.constant 8 : i32
      %18 = vector.broadcast %c8_i32_7 : i32 to vector<1x8xi32>
      %19 = arith.cmpi slt, %17, %18 : vector<1x8xi32>
      %cst_8 = arith.constant 2.500000e-01 : f32
      %20 = vector.broadcast %cst_8 : f32 to vector<1x8xf32>
      %21 = arith.cmpf olt, %13, %20 : vector<1x8xf32>
      %22 = arith.andi %21, %19 : vector<1x8xi1>
      %c8_i32_9 = arith.constant 8 : i32
      %23 = vector.broadcast %c8_i32_9 : i32 to vector<1x8xi32>
      %24 = arith.select %22, %17, %23 : vector<1x8xi1>, vector<1x8xi32>
      %c0_10 = arith.constant 0 : index
      %25 = memref.load %arg4[%c0_10] : memref<1xi32, #tpu.memory_space<smem>>
      %26 = vector.shape_cast %24 : vector<1x8xi32> to vector<1x1x8xi32>
      %cst_11 = arith.constant dense<2147483647> : vector<1xi32>
      %27 = vector.multi_reduction <minsi>, %26, %cst_11 [1, 2] : vector<1x1x8xi32> to vector<1xi32>
      %28 = vector.shape_cast %27 : vector<1xi32> to vector<1x1x1xi32>
      %29 = vector.extract %28[0, 0, 0] : i32 from vector<1x1x1xi32>
      %30 = arith.minsi %25, %29 : i32
      %c0_12 = arith.constant 0 : index
      %31 = memref.load %arg4[%c0_12] : memref<1xi32, #tpu.memory_space<smem>>
      memref.store %30, %arg4[%c0_12] : memref<1xi32, #tpu.memory_space<smem>>
      %32 = vector.broadcast %30 : i32 to vector<1x8xi32>
      %33 = arith.cmpi slt, %17, %32 : vector<1x8xi32>
      %34 = arith.andi %19, %33 : vector<1x8xi1>
      %cst_13 = arith.constant 0.000000e+00 : f32
      %35 = vector.broadcast %cst_13 : f32 to vector<1x8xf32>
      %36 = arith.select %34, %13, %35 : vector<1x8xi1>, vector<1x8xf32>
      %37 = vector.shape_cast %36 : vector<1x8xf32> to vector<1x1x8xf32>
      %cst_14 = arith.constant dense<0.000000e+00> : vector<1xf32>
      %38 = vector.multi_reduction <add>, %37, %cst_14 [1, 2] : vector<1x1x8xf32> to vector<1xf32>
      %39 = vector.shape_cast %38 : vector<1xf32> to vector<1x1x1xf32>
      %40 = vector.extract %39[0, 0, 0] : f32 from vector<1x1x1xf32>
      %c0_15 = arith.constant 0 : index
      %41 = memref.load %arg3[%c0_15] : memref<1xf32, #tpu.memory_space<smem>>
      %42 = arith.addf %41, %40 : f32
      %c0_16 = arith.constant 0 : index
      %43 = memref.load %arg3[%c0_16] : memref<1xf32, #tpu.memory_space<smem>>
      memref.store %42, %arg3[%c0_16] : memref<1xf32, #tpu.memory_space<smem>>
    } else {
    }
    %c0_i32_2 = arith.constant 0 : i32
    %8 = arith.cmpi eq, %arg0, %c0_i32_2 : i32
    %9 = arith.extui %8 : i1 to i32
    %c0_i32_3 = arith.constant 0 : i32
    %10 = arith.cmpi ne, %9, %c0_i32_3 : i32
    scf.if %10 {
      %c0_4 = arith.constant 0 : index
      %11 = memref.load %arg3[%c0_4] : memref<1xf32, #tpu.memory_space<smem>>
      %c0_5 = arith.constant 0 : index
      %c0_6 = arith.constant 0 : index
      %12 = memref.load %arg2[%c0_5, %c0_6] : memref<1x1xf32, #tpu.memory_space<smem>>
      memref.store %11, %arg2[%c0_5, %c0_6] : memref<1x1xf32, #tpu.memory_space<smem>>
    } else {
    }
    return
  }
  func.func @transform_0(%arg0: i32) -> (i32, i32) {
    %c0_i32 = arith.constant 0 : i32
    %c0_i32_0 = arith.constant 0 : i32
    return %c0_i32, %arg0 : i32, i32
  }
  func.func @transform_1(%arg0: i32) -> (i32, i32) {
    %c0_i32 = arith.constant 0 : i32
    %c0_i32_0 = arith.constant 0 : i32
    %c0_i32_1 = arith.constant 0 : i32
    return %c0_i32, %c0_i32_0 : i32, i32
  }
}

</mosaic_0001>

<bundles_post_ra>
// kernel: yolov8_target_pallas.1
= control target key start
LH: loop header
LB: loop body
LE: loop exit
PB: predicated region body
PF: predicated region fallthrough
CT: control target
= control target key end

     0   :  { %6 = vsyncpa [#allocation5], 0  ;;  %s118_s6 = smov 0.0   ;;  %s119_s7 = smov 8   ;;  %vm24_vm0 = vcmask 64512   ;;  %v32_v4 = vlaneseq  ;;  %vm65_vm6 = vcmask 57344   ;;  %s139_s0 = inlined_call_operand.vmem [shape: f32[8,8], index: 0, kind: input, shape index: {}]   ;;  %s140_s1 = inlined_call_operand.hbm [shape: f32[1,1], index: 1, kind: output, shape index: {}]  }
   0x1   :  { %14 = sst [smem:[#allocation2]] %s118_s6  ;;  %v23_v0 = vld [vmem:[%s139_s0] sm:$0xff]  ;;  %s120_s15 = smov [#allocation4]  }
   0x2   :  { %16 = sst [smem:[#allocation3]] %s119_s7  ;;  %v25_v1 = vsel %vm24_vm0, %v23_v0, -inf  ;;  %v33_v7 = vand.u32 127, %v32_v4 }
   0x3   :  { %v26_v2 = vrot.slane %v25_v1, 4  ;;  %s40_s0 = sld [smem:[#allocation3]] }
   0x4   :  { %vm36_vm1 = vcmp.lt.s32.totalorder %v33_v7, 8  ;;  %s76_s11 = sld [smem:[#allocation2]] }
   0x5   :  { %v27_v3 = vmax.f32 %v25_v1, %v26_v2 }
   0x7   :  { %v28_v5 = vrot.slane %v27_v3, 2 }
   0x9   :  { %v29_v6 = vmax.f32 %v27_v3, %v28_v5 }
   0xb   :  { %v30_v8 = vrot.slane %v29_v6, 1 }
   0xd   :  { %v31_v9 = vmax.f32 %v29_v6, %v30_v8 }
   0xf   :  { %vm37_vm2 = vcmp.lt.f32.partialorder %v31_v9, 0.25 }
  0x10   :  { %vm38_vm3 = vmand %vm37_vm2, %vm36_vm1 }
  0x11   :  { %v39_v10 = vsel %vm38_vm3, %v33_v7, 8 }
  0x12   :  { %v41_v11 = vsel %vm24_vm0, %v39_v10, 2147483647 }
  0x13   :  { %v43_v12 = vshra.s32 %v41_v11, 16  ;;  %v42_v14 = vand.u32 65535, %v41_v11 }
  0x15   :  { %v45_v13 = vcvt.s32.f32 %v43_v12  ;;  %v44_v15 = vcvt.s32.f32 %v42_v14 }
  0x17   :  { %46 = vmin.xlane.f32.xlu0 %v45_v13 }
  0xa0   :  { %v47_v16 = vpop.xlane.xlu0 %46 }
  0xa1   :  { %vm48_vm4 = vcmp.eq.f32.partialorder %v45_v13, %v47_v16  ;;  %v53_v18 = vcvt.f32.s32 %v47_v16 }
  0xa2   :  { %v49_v17 = vsel %vm48_vm4, %v44_v15, inf }
  0xa3   :  { %50 = vmin.xlane.f32.xlu0 %v49_v17  ;;  %v54_v21 = vshll.u32 %v53_v18, 16 }
 0x12c   :  { %v51_v19 = vpop.xlane.xlu0 %50 }
 0x12d   :  { %v52_v20 = vcvt.f32.s32 %v51_v19 }
 0x12f   :  { %v55_v22 = vadd.s32 %v54_v21, %v52_v20 }
 0x131   :  { %100 = vpush %v55_v22 }
 0x162   :  { %s101_s10 = spop %100 }
 0x163   :  { %p57_p0 = scmp.lt.s32.totalorder %s40_s0, %s101_s10 }
 0x165   :  { %s142_s0 = smov (!%p57_p0, %s40_s0), %s101_s10 }
 0x166   :  { %60 = sst [smem:[#allocation3]] %s142_s0  ;;  %v61_v23 = vstv %s142_s0 }
 0x167   :  { %vm62_vm5 = vcmp.lt.s32.totalorder %v33_v7, %v61_v23 }
 0x168   :  { %vm63_vm7 = vmand %vm36_vm1, %vm62_vm5 }
 0x169   :  { %v64_v24 = vsel %vm63_vm7, %v31_v9, 0.0 }
 0x16a   :  { %v66_v25 = vsel %vm65_vm6, %v64_v24, 0.0 }
 0x16b   :  { %67 = vadd.xlane.f32.xlu1 %v66_v25 }
 0x1f4   :  { %v68_v26 = vpop.xlane.xlu1 %67 }
 0x1f5   :  { %v69_v27 = vrot.slane %v68_v26, 4 }
 0x1f7   :  { %v70_v28 = vadd.f32 %v69_v27, %v68_v26 }
 0x1f9   :  { %v71_v29 = vrot.slane %v70_v28, 2 }
 0x1fb   :  { %v72_v30 = vadd.f32 %v71_v29, %v70_v28 }
 0x1fd   :  { %v73_v31 = vrot.slane %v72_v30, 1 }
 0x1ff   :  { %v74_v32 = vadd.f32 %v73_v31, %v72_v30 }
 0x201   :  { %102 = vpush %v74_v32 }
 0x232   :  { %s103_s12 = spop %102 }
 0x233   :  { %s77_s13 = sadd.f32 %s103_s12, %s76_s11 }
 0x235   :  { %79 = sst [smem:[#allocation2]] %s77_s13 }
 0x236   :  { %s83_s14 = sld [smem:[#allocation2]] }
 0x23c   :  { %85 = sst [smem:[#allocation4]] %s83_s14 }
 0x23d   :  { %93 = dma.smem_to_hbm %s120_s15, 16, %s140_s1, [#allocation5]  }
 0x23e   :  { %116 = dma.done.wait [#allocation5], 16  }
 0x23f   :  { %117 = vsyncadd [#allocation5], 4294967280 }
 0x240   :  { %97 = sfence }
 0x241   :  { %98 = vsyncpa [#allocation5], 1 }

</bundles_post_ra>
